<compile_context>
chip_gen: v6e
topology: v6e:2x2x1
jax: 0.10.0
libtpu: 0.0.40
codegen_flags: <defaults>
</compile_context>

<pallas_src>
import jax
import jax.numpy as jnp
from jax import lax
from jax.experimental import pallas as pl
from jax.experimental.pallas import tpu as pltpu


# ----------------------------------------------------------------------------
# Tiling plan
# ----------------------------------------------------------------------------
def _round_up(x: int, m: int) -> int:
    return (x + m - 1) // m * m


def _cdiv(a: int, b: int) -> int:
    return (a + b - 1) // b


_NUM_K_SPLITS = 2                    # leading "parallel" axis (dual-TC on v7x)
_MIN_TOTAL_TILES = 4                 # >=2 K tiles per split: DMA/compute overlap
_MAX_TILE_BYTES = 8 * 1024 * 1024    # per F buffer; 4-8 MiB is the BW sweet spot


def _vmem_plan():
    """(vmem_limit_bytes, usable_bytes) sized for the current TPU generation."""
    cap = 64 * 1024 * 1024                         # conservative fallback (v7x)
    try:
        cap = int(pltpu.get_tpu_info().vmem_capacity_bytes)
    except Exception:
        pass
    limit = min(cap * 3 // 4, 100 * 1024 * 1024)   # ~96 MiB v5e/v6e, ~48 MiB v7x
    return limit, int(limit * 0.85)                # keep ~15% headroom


def _choose_tk(m: int, k: int, itemsize: int, usable_bytes: int) -> int:
    """Largest lane-dense K tile s.t. 2x F buffers + gram residents fit VMEM."""
    kr = _round_up(k, 128)
    rows_f = _round_up(m, (8 * 4) // itemsize)     # sublane packing of F tiles
    rows_g = _round_up(m, 8)
    lanes_g = _round_up(m, 128)
    resident = 3 * rows_g * lanes_g * 4            # f32 acc + 2x out buffers
    headroom = max(usable_bytes - resident, 2 * rows_f * 128 * itemsize)
    tk = headroom // (2 * rows_f * itemsize)                       # VMEM bound
    tk = min(tk, max(128, _MAX_TILE_BYTES // (rows_f * itemsize)))  # BW sweet spot
    if kr >= _MIN_TOTAL_TILES * 128:                # keep enough tiles to pipeline
        tk = min(tk, kr // _MIN_TOTAL_TILES)        # and to split across 2 cores
    tk = max(128, min(kr, tk // 128 * 128))
    # Prefer a width that evenly divides kr (no wasted tail tile), but never
    # shrink the tile by more than 2x for it.
    for cand in range(tk, 127, -128):
        if kr % cand == 0:
            if 2 * cand >= tk:
                tk = cand
            break
    return tk


# ----------------------------------------------------------------------------
# Kernel
# ----------------------------------------------------------------------------
def _make_gram_kernel(k: int, tk: int, nk_per: int, needs_mask: bool):
    """Accumulate this split's partial gram over its K tiles."""

    def kernel(f_ref, out_ref, acc_ref):
        kk = pl.program_id(1)

        @pl.when(kk == 0)
        def _():
            acc_ref[...] = jnp.zeros_like(acc_ref)

        f = f_ref[...]
        if needs_mask:
            # Intended global K offset from the program ids (NOT the clamped
            # index_map): zero columns past the true K extent, so partial and
            # excess tiles contribute nothing.
            gk = pl.program_id(0) * nk_per + kk
            col = gk * tk + lax.broadcasted_iota(jnp.int32, f.shape, 1)
            f = jnp.where(col < k, f, jnp.zeros_like(f))

        # acc += F_tile @ F_tile^T without materializing a transpose
        # (MXU-direct feed; f32 accumulation).
        acc_ref[...] += lax.dot_general(
            f, f,
            dimension_numbers=(((1,), (1,)), ((), ())),
            preferred_element_type=jnp.float32,
        )

        @pl.when(kk == pl.num_programs(1) - 1)
        def _():
            out_ref[...] = acc_ref[...]

    return kernel


# ----------------------------------------------------------------------------
# Wrapper
# ----------------------------------------------------------------------------
def _gram_pallas(features_flat, denom):
    """Gram matrix of (M, K) flattened features, normalized by `denom`.

    Accepts any float dtype (feed bf16 from the producer for ~2x less HBM
    traffic — do not up-cast here); accumulation is f32 on the MXU.
    Returns the (M, M) f32 gram.
    """
    m, k = features_flat.shape
    itemsize = jnp.dtype(features_flat.dtype).itemsize
    vmem_limit, usable = _vmem_plan()
    tk = _choose_tk(m, k, itemsize, usable)

    nk_total = _cdiv(k, tk)
    nsplits = _NUM_K_SPLITS if nk_total >= _NUM_K_SPLITS else 1
    nk_per = _cdiv(nk_total, nsplits)
    clamp = nsplits * nk_per > nk_total            # excess (fully OOB) tail tiles
    needs_mask = clamp or (k % tk != 0)

    def f_index_map(c, kk):
        gk = c * nk_per + kk
        if clamp:
            gk = jnp.minimum(gk, nk_total - 1)     # excess tiles re-read the last
        return (0, gk)                             # valid tile; mask zeroes them

    kernel = _make_gram_kernel(k, tk, nk_per, needs_mask)

    cost = pl.CostEstimate(
        flops=2 * m * m * k,
        transcendentals=0,
        bytes_accessed=m * k * itemsize + nsplits * m * m * 4,
    )

    partials = pl.pallas_call(
        kernel,
        grid=(nsplits, nk_per),
        in_specs=[pl.BlockSpec((m, tk), f_index_map)],
        out_specs=pl.BlockSpec((None, m, m), lambda c, kk: (c, 0, 0)),
        out_shape=jax.ShapeDtypeStruct((nsplits, m, m), jnp.float32),
        scratch_shapes=[pltpu.VMEM((m, m), jnp.float32)],
        compiler_params=pltpu.CompilerParams(
            dimension_semantics=("parallel", "arbitrary"),  # K is the reduction
            vmem_limit_bytes=vmem_limit,
        ),
        cost_estimate=cost,
    )(features_flat)

    # Tiny epilogue (O(M^2), negligible vs. the O(M^2 K) gram): combine the
    # per-split partial grams and normalize.
    return jnp.sum(partials, axis=0) * (1.0 / float(denom))


# ----------------------------------------------------------------------------
# Module
# ----------------------------------------------------------------------------
class StyleLossPallas:
    """JAX/Pallas re-implementation of the PyTorch StyleLoss module."""

    def __init__(self, target_features):
        b, c, h, w = target_features.shape
        f = target_features.reshape(b * c, h * w)
        self.target = _gram_pallas(f, b * c * h * w)       # (M, M) f32
        # Mirrors the PyTorch module: F.mse_loss(target, target) == 0.
        self.loss = jnp.float32(0.0)

    def __call__(self, features):
        b, c, h, w = features.shape
        g = _gram_pallas(features.reshape(b * c, h * w), b * c * h * w)
        # NOTE: mutating self.loss is fine eagerly; under jax.jit/scan treat
        # the loss as a returned value instead of module state.
        self.loss = jnp.mean((g - self.target) ** 2)
        return features    # identity pass-through, like the PyTorch module


# ----------------------------------------------------------------------------
# Reference & demo
# ----------------------------------------------------------------------------
def _gram_ref(x):
    b, c, h, w = x.shape
    f = x.reshape(b * c, h * w).astype(jnp.float32)
    g = jnp.dot(f, f.T, precision=lax.Precision.HIGHEST)
    return g / (b * c * h * w)


if __name__ == "__main__":
    key = jax.random.PRNGKey(0)
    k_tgt, k_in, k_mask, k_split = jax.random.split(key, 4)

    # Main demo: (B, C, H, W) = (2, 4, 16, 16).  Real NST layers (C >= 64)
    # give a lane-dense gram and multi-MiB K tiles; these tiny shapes are for
    # correctness only.
    target_features = jax.random.normal(k_tgt, (2, 4, 16, 16), dtype=jnp.float32)
    features = jax.random.normal(k_in, (2, 4, 16, 16), dtype=jnp.float32)

    layer = StyleLossPallas(target_features)
    out = jax.block_until_ready(layer(features))
    loss = jax.block_until_ready(layer.loss)

    g_ref = _gram_ref(features)
    t_ref = _gram_ref(target_features)
    loss_ref = jnp.mean((g_ref - t_ref) ** 2)

    assert out.shape == features.shape and jnp.allclose(out, features)
    assert jnp.allclose(layer.target, t_ref, atol=1e-5, rtol=1e-5)
    assert jnp.allclose(loss, loss_ref, atol=1e-5, rtol=1e-5)

    # Tail-masking path: K = 12*12 = 144 is not a multiple of the 128-lane tile.
    x_mask = jax.random.normal(k_mask, (1, 8, 12, 12), dtype=jnp.float32)
    g_mask = jax.block_until_ready(_gram_pallas(x_mask.reshape(8, 144), 8 * 144))
    assert jnp.allclose(g_mask, _gram_ref(x_mask), atol=1e-5, rtol=1e-5)

    # Multi-tile + 2-way "parallel" K-split path (grid (2, 2) at these sizes).
    x_split = jax.random.normal(k_split, (2, 4, 32, 32), dtype=jnp.float32)
    g_split = jax.block_until_ready(_gram_pallas(x_split.reshape(8, 1024), 8 * 1024))
    assert jnp.allclose(g_split, _gram_ref(x_split), atol=1e-5, rtol=1e-5)

    print("KERNEL_OK")
</pallas_src>

<mosaic_0001>
module attributes {stable_mosaic.version = 11 : i64} {
  func.func @kernel(%arg0: i32, %arg1: i32, %arg2: memref<8x256xf32, #tpu.memory_space<vmem>>, %arg3: memref<1x8x8xf32, #tpu.memory_space<vmem>>, %arg4: memref<8x8xf32, #tpu.memory_space<vmem>>) attributes {dimension_semantics = [#tpu.dimension_semantics<parallel>, #tpu.dimension_semantics<arbitrary>], iteration_bounds = array<i64: 1, 1>, scalar_prefetch = 0 : i64, scratch_operands = 1 : i64, tpu.core_type = #tpu.core_type<tc>, window_params = [{transform_indices = @transform_0, window_bounds = array<i64: 8, 256>}, {transform_indices = @transform_1, window_bounds = array<i64: 1, 8, 8>}]} {
    %c0_i32 = arith.constant 0 : i32
    %0 = arith.cmpi eq, %arg1, %c0_i32 : i32
    %1 = arith.extui %0 : i1 to i32
    %c0_i32_0 = arith.constant 0 : i32
    %2 = arith.cmpi ne, %1, %c0_i32_0 : i32
    scf.if %2 {
      %cst_8 = arith.constant 0.000000e+00 : f32
      %11 = vector.broadcast %cst_8 : f32 to vector<8x8xf32>
      %c0_9 = arith.constant 0 : index
      %c0_10 = arith.constant 0 : index
      %12 = vector.load %arg4[%c0_9, %c0_10] : memref<8x8xf32, #tpu.memory_space<vmem>>, vector<8x8xf32>
      tpu.vector_store %arg4[%c0_9, %c0_10], %11 {strides = array<i32>} : memref<8x8xf32, #tpu.memory_space<vmem>>, vector<8x8xf32>,
    } else {
    }
    %c0 = arith.constant 0 : index
    %c0_1 = arith.constant 0 : index
    %3 = vector.load %arg2[%c0, %c0_1] : memref<8x256xf32, #tpu.memory_space<vmem>>, vector<8x256xf32>
    %c0_2 = arith.constant 0 : index
    %c0_3 = arith.constant 0 : index
    %4 = vector.load %arg4[%c0_2, %c0_3] : memref<8x8xf32, #tpu.memory_space<vmem>>, vector<8x8xf32>
    %cst = arith.constant dense<0.000000e+00> : vector<8x8xf32>
    %5 = tpu.matmul %3, %3, %cst {dimension_numbers = #tpu.dot_dimension_numbers<[1], [1], [0], [0], [0, 0, 1, 0], [], []>} : vector<8x256xf32>, vector<8x256xf32>, vector<8x8xf32> -> vector<8x8xf32>
    %6 = arith.addf %4, %5 : vector<8x8xf32>
    %c0_4 = arith.constant 0 : index
    %c0_5 = arith.constant 0 : index
    %7 = vector.load %arg4[%c0_4, %c0_5] : memref<8x8xf32, #tpu.memory_space<vmem>>, vector<8x8xf32>
    tpu.vector_store %arg4[%c0_4, %c0_5], %6 {strides = array<i32>} : memref<8x8xf32, #tpu.memory_space<vmem>>, vector<8x8xf32>,
    %c0_i32_6 = arith.constant 0 : i32
    %8 = arith.cmpi eq, %arg1, %c0_i32_6 : i32
    %9 = arith.extui %8 : i1 to i32
    %c0_i32_7 = arith.constant 0 : i32
    %10 = arith.cmpi ne, %9, %c0_i32_7 : i32
    scf.if %10 {
      %c0_8 = arith.constant 0 : index
      %c0_9 = arith.constant 0 : index
      %11 = vector.load %arg4[%c0_8, %c0_9] : memref<8x8xf32, #tpu.memory_space<vmem>>, vector<8x8xf32>
      %c0_10 = arith.constant 0 : index
      %c0_11 = arith.constant 0 : index
      %c0_12 = arith.constant 0 : index
      %12 = vector.load %arg3[%c0_10, %c0_11, %c0_12] : memref<1x8x8xf32, #tpu.memory_space<vmem>>, vector<1x8x8xf32>
      %13 = vector.shape_cast %12 : vector<1x8x8xf32> to vector<8x8xf32>
      %14 = vector.shape_cast %11 : vector<8x8xf32> to vector<1x8x8xf32>
      tpu.vector_store %arg3[%c0_10, %c0_11, %c0_12], %14 {strides = array<i32>} : memref<1x8x8xf32, #tpu.memory_space<vmem>>, vector<1x8x8xf32>,
    } else {
    }
    return
  }
  func.func @transform_0(%arg0: i32, %arg1: i32) -> (i32, i32) {
    %c1_i32 = arith.constant 1 : i32
    %0 = arith.muli %arg0, %c1_i32 : i32
    %1 = arith.addi %0, %arg1 : i32
    %c0_i32 = arith.constant 0 : i32
    %c0_i32_0 = arith.constant 0 : i32
    return %c0_i32, %1 : i32, i32
  }
  func.func @transform_1(%arg0: i32, %arg1: i32) -> (i32, i32, i32) {
    %c0_i32 = arith.constant 0 : i32
    %c0_i32_0 = arith.constant 0 : i32
    %c0_i32_1 = arith.constant 0 : i32
    return %arg0, %c0_i32, %c0_i32_0 : i32, i32, i32
  }
}

</mosaic_0001>

<bundles_post_ra>
// kernel: tpu_custom_call.1
= control target key start
LH: loop header
LB: loop body
LE: loop exit
PB: predicated region body
PF: predicated region fallthrough
CT: control target
= control target key end

     0   :  { %6 = vsyncpa [#allocation4], 0  ;;  %s198_s0 = inlined_call_operand.hbm [shape: f32[8,256], index: 0, kind: input, shape index: {}]   ;;  %s199_s1 = inlined_call_operand.hbm [shape: f32[1,8,8], index: 1, kind: output, shape index: {}]  }
   0x1   :  { %7 = vsyncpa [#allocation5], 0  ;;  %s176_s6 = smov [#allocation3]  }
   0x2   :  { %s18_s7 = sshll.u32 %s176_s6, 4  ;;  %s19_s7 = int_to_ptr.vmem [resolvable:$true] %s18_s7 }
   0x3   :  { %s140_s8 = scalar_lea.vmem %s19_s7, 256  ;;  %p145_p1 = scmp.lt.s32.totalorder %s19_s7, %s19_s7 }
   0x4   :  { %p141_p0 = scmp.ne.s32.totalorder %s19_s7, %s140_s8  ;;  %p146_p2 = scmp.lt.s32.totalorder %s140_s8, %s140_s8 }
   0x6   :  { %p147_p3 = por %p146_p2, %p145_p1 }
   0x8   :  { %p148_p4 = pnand %p147_p3, %p141_p0 }
   0xa   :  { %151 = shalt.err (!%p148_p4)
}
   0xb   :  { %21 = dma.hbm_to_vmem [thread:$0]  %s198_s0, 256, %s19_s7, [#allocation4]  }
   0xc   :  { %172 = dma.done.wait [#allocation4], 256  }
   0xd   :  { %173 = vsyncadd [#allocation4], 4294967040  ;;  %vm31_vm0 = vcmask 64512   ;;  %v177_v0 = vmov 0.0   ;;  %v34_v1 = vld [vmem:[#allocation3 + $0x8] sm:$0xff]  ;;  %v33_v2 = vld [vmem:[#allocation3] sm:$0xff] }
   0xe   :  { %32 = vst.msk [vmem:[#allocation2] sm:$0xff] %vm31_vm0, %v177_v0  ;;  %66 = vmatprep.subr.mxu0 %v34_v1  ;;  %100 = vmatprep.mubr.f32.mxu0 %v34_v1  ;;  %s178_s11 = smov [#allocation6]  }
   0xf   :  { %67 = vmatpush1.xpose.msra.mxu0 %v33_v2  ;;  %s120_s0 = sshll.u32 %s178_s11, 4  ;;  %s121_s0 = int_to_ptr.vmem [resolvable:$true] %s120_s0 }
  0x10   :  { %s152_s12 = scalar_lea.vmem %s121_s0, 128  ;;  %p157_p6 = scmp.lt.s32.totalorder %s121_s0, %s121_s0 }
  0x11   :  { %p153_p5 = scmp.ne.s32.totalorder %s121_s0, %s152_s12  ;;  %p158_p7 = scmp.lt.s32.totalorder %s152_s12, %s152_s12 }
  0x12   :  { %101 = vmatmul.mubr.f32.vlgmr.msra.gmra.mxu0 %v33_v2 }
  0x13   :  { %p159_p8 = por %p158_p7, %p157_p6 }
  0x15   :  { %v35_v3 = vld [vmem:[#allocation2] sm:$0xff]  ;;  %p160_p9 = pnand %p159_p8, %p153_p5 }
  0xd2   :  { %v102_v4 = vpop.f32.mrf.mxu0 }
  0xd3   :  { %v106_v5 = vadd.f32 %v102_v4, %v35_v3 }
  0xd4   :  { %v104_v6 = vpop.f32.mrf.mxu0 }
  0xd5   :  { %108 = vst.msk [vmem:[#allocation2] sm:$0xff] %vm31_vm0, %v106_v5 }
  0xdc   :  { %v112_v7 = vld [vmem:[#allocation2] sm:$0xff] }
  0xdd   :  { %113 = vst.msk [vmem:[#allocation6] sm:$0xff] %vm31_vm0, %v112_v7 }
  0xde   :  { %163 = shalt.err (!%p160_p9)
}
  0xdf   :  { %123 = dma.vmem_to_hbm [thread:$0]  %s121_s0, 128, %s199_s1, [#allocation5]  }
  0xe0   :  { %174 = dma.done.wait [#allocation5], 128  }
  0xe1   :  { %175 = vsyncadd [#allocation5], 4294967168 }
  0xe2   :  { %127 = vsyncpa [#allocation4], 1 }
  0xe3   :  { %128 = vsyncpa [#allocation5], 1 }

</bundles_post_ra>
